<compile_context>
chip_gen: v6e
topology: v6e:2x2x1
jax: 0.10.0
libtpu: 0.0.40
codegen_flags: <defaults>
</compile_context>

<pallas_src>
import functools

import jax
import jax.numpy as jnp
from jax.experimental import pallas as pl
from jax.experimental.pallas import tpu as pltpu

LANE = 128
SUBLANE = 8


def _round_up(x, m):
    return ((x + m - 1) // m) * m


# ----------------------------------------------------------------------------
# Fused Pallas kernel: out = relu(x @ W2 + b2) @ W4 + b4
# ----------------------------------------------------------------------------
def _mlp_kernel(x_ref, w2_ref, b2_ref, w4_ref, b4_ref, o_ref):
    # Cast the activation to bf16 in-register (no extra HBM pass over x);
    # weights are already stored in bf16.  MXU: bf16 x bf16 -> f32 accumulate.
    xb = x_ref[...].astype(jnp.bfloat16)
    h = jnp.dot(xb, w2_ref[...], preferred_element_type=jnp.float32)
    # Bias + ReLU epilogue in f32 on the VPU; hidden activation never hits HBM.
    h = jnp.maximum(h + b2_ref[...], 0.0)
    o = jnp.dot(h.astype(jnp.bfloat16), w4_ref[...],
                preferred_element_type=jnp.float32)
    o_ref[...] = (o + b4_ref[...]).astype(o_ref.dtype)


# ----------------------------------------------------------------------------
# One-time parameter packing (outside the jitted forward)
# ----------------------------------------------------------------------------
def prepare_params(params):
    """Transpose to (in, out) layout, pad output dims to 128 lanes, cast the
    weight matrices to bf16 (biases stay f32).

    params (torch layout):
      w2: (50, 50)  (out, in)      b2: (50,)
      w4: (num_classes, 128)       b4: (num_classes,)
    """
    w2, b2, w4, b4 = params["w2"], params["b2"], params["w4"], params["b4"]
    hid, f_in = w2.shape          # 50, 50
    nc, fc4_in = w4.shape         # num_classes, 128

    hid_p = _round_up(max(hid, fc4_in), LANE)   # 128: fc2-out / fc4-in lanes
    out_p = _round_up(nc, LANE)                 # 128: lane-dense output block

    w2t = jnp.zeros((f_in, hid_p), jnp.bfloat16).at[:, :hid].set(
        w2.T.astype(jnp.bfloat16))
    b2p = jnp.zeros((1, hid_p), jnp.float32).at[0, :hid].set(b2)
    w4t = jnp.zeros((hid_p, out_p), jnp.bfloat16).at[:fc4_in, :nc].set(
        w4.T.astype(jnp.bfloat16))
    b4p = jnp.zeros((1, out_p), jnp.float32).at[0, :nc].set(b4)
    return {"w2": w2t, "b2": b2p, "w4": w4t, "b4": b4p}


# ----------------------------------------------------------------------------
# Forward wrapper
# ----------------------------------------------------------------------------
def mlp_forward(x, packed, *, num_classes):
    """x: (B, 50) float32 -> (B, num_classes) float32."""
    w2, b2, w4, b4 = packed["w2"], packed["b2"], packed["w4"], packed["b4"]
    b, f_in = x.shape
    assert f_in == w2.shape[0], (f_in, w2.shape)
    hid_p = w2.shape[1]
    out_p = w4.shape[1]

    # --- batch tiling ------------------------------------------------------
    # Only the batch axis is padded; the 50-wide feature axis is loaded at full
    # extent (no lane padding, no extra XLA pad over x's lanes).
    if b <= 256:
        n_tiles = 1
    else:
        # >= 2 grid steps so v7x's two TensorCores both get work; ~512-row
        # tiles amortize per-grid-step overhead on every generation.
        n_tiles = max(2, pl.cdiv(b, 512))
    tm = _round_up(pl.cdiv(b, n_tiles), SUBLANE)
    bp = n_tiles * tm                      # exact multiple of tm by construction
    xp = x if bp == b else jnp.pad(x, ((0, bp - b), (0, 0)))

    flops = 2 * bp * (f_in * hid_p + hid_p * out_p)
    bytes_accessed = (xp.size * xp.dtype.itemsize
                      + w2.size * w2.dtype.itemsize
                      + w4.size * w4.dtype.itemsize
                      + b2.size * b2.dtype.itemsize
                      + b4.size * b4.dtype.itemsize
                      + bp * out_p * 4)

    out = pl.pallas_call(
        _mlp_kernel,
        out_shape=jax.ShapeDtypeStruct((bp, out_p), jnp.float32),
        grid=(n_tiles,),
        in_specs=[
            pl.BlockSpec((tm, f_in), lambda i: (i, 0)),       # x: full 50-wide K
            pl.BlockSpec((f_in, hid_p), lambda i: (0, 0)),    # W2 (bf16)
            pl.BlockSpec((1, hid_p), lambda i: (0, 0)),       # b2 (f32)
            pl.BlockSpec((hid_p, out_p), lambda i: (0, 0)),   # W4 (bf16)
            pl.BlockSpec((1, out_p), lambda i: (0, 0)),       # b4 (f32)
        ],
        out_specs=pl.BlockSpec((tm, out_p), lambda i: (i, 0)),
        compiler_params=pltpu.CompilerParams(
            dimension_semantics=("parallel",)),
        cost_estimate=pl.CostEstimate(
            flops=flops, transcendentals=0, bytes_accessed=bytes_accessed),
    )(xp, w2, b2, w4, b4)

    # Single row+column slice back to the logical shape.
    return out[:b, :num_classes]


# ----------------------------------------------------------------------------
# Demo / self-check
# ----------------------------------------------------------------------------
def _reference(x, params):
    """Pure-JAX reference mirroring the kernel's bf16-operand / f32-accumulate
    math and the zero-pad interpretation of the fc2(50) -> fc4(128) mismatch."""
    xb = x.astype(jnp.bfloat16)
    w2b = params["w2"].T.astype(jnp.bfloat16)
    h = jnp.maximum(
        jnp.dot(xb, w2b, preferred_element_type=jnp.float32) + params["b2"], 0.0)
    pad = params["w4"].shape[1] - h.shape[1]          # 128 - 50
    hp = jnp.pad(h, ((0, 0), (0, pad))).astype(jnp.bfloat16)
    w4b = params["w4"].T.astype(jnp.bfloat16)
    return jnp.dot(hp, w4b, preferred_element_type=jnp.float32) + params["b4"]


if __name__ == "__main__":
    num_classes = 5
    key = jax.random.PRNGKey(0)
    k1, k2, k3, k4, kx, kx2 = jax.random.split(key, 6)

    # torch-layout parameters (fc3 is declared in the module but unused).
    params = {
        "w2": jax.random.normal(k1, (50, 50), jnp.float32) / jnp.sqrt(50.0),
        "b2": jax.random.normal(k2, (50,), jnp.float32) * 0.01,
        "w4": jax.random.normal(k3, (num_classes, 128), jnp.float32) / jnp.sqrt(128.0),
        "b4": jax.random.normal(k4, (num_classes,), jnp.float32) * 0.01,
    }
    packed = prepare_params(params)

    fwd = jax.jit(functools.partial(mlp_forward, num_classes=num_classes))

    # Small batch (single 8-row tile).
    x = jax.random.normal(kx, (2, 50), jnp.float32)
    out = jax.block_until_ready(fwd(x, packed))
    out_ref = _reference(x, params)
    assert out.shape == (2, num_classes), out.shape
    assert bool(jnp.all(jnp.isfinite(out)))
    assert jnp.allclose(out, out_ref, rtol=1e-2, atol=1e-2), (
        float(jnp.max(jnp.abs(out - out_ref))))

    # Ragged larger batch (exercises the multi-step grid / batch-pad path that
    # was previously buggy: b=700 -> 2 tiles of 352 rows).
    x2 = jax.random.normal(kx2, (700, 50), jnp.float32)
    out2 = jax.block_until_ready(fwd(x2, packed))
    out2_ref = _reference(x2, params)
    assert out2.shape == (700, num_classes), out2.shape
    assert jnp.allclose(out2, out2_ref, rtol=1e-2, atol=1e-2), (
        float(jnp.max(jnp.abs(out2 - out2_ref))))

    print("KERNEL_OK")
</pallas_src>

<mosaic_0001>
module attributes {stable_mosaic.version = 11 : i64} {
  func.func @_mlp_kernel(%arg0: i32, %arg1: memref<8x50xf32, #tpu.memory_space<vmem>>, %arg2: memref<50x128xbf16, #tpu.memory_space<vmem>>, %arg3: memref<1x128xf32, #tpu.memory_space<vmem>>, %arg4: memref<128x128xbf16, #tpu.memory_space<vmem>>, %arg5: memref<1x128xf32, #tpu.memory_space<vmem>>, %arg6: memref<8x128xf32, #tpu.memory_space<vmem>>) attributes {dimension_semantics = [#tpu.dimension_semantics<parallel>], iteration_bounds = array<i64: 1>, scalar_prefetch = 0 : i64, scratch_operands = 0 : i64, tpu.core_type = #tpu.core_type<tc>, window_params = [{transform_indices = @transform_0, window_bounds = array<i64: 8, 50>}, {pipeline_mode = #tpu.pipeline_mode<synchronous>, transform_indices = @transform_1, window_bounds = array<i64: 50, 128>}, {pipeline_mode = #tpu.pipeline_mode<synchronous>, transform_indices = @transform_2, window_bounds = array<i64: 1, 128>}, {pipeline_mode = #tpu.pipeline_mode<synchronous>, transform_indices = @transform_3, window_bounds = array<i64: 128, 128>}, {pipeline_mode = #tpu.pipeline_mode<synchronous>, transform_indices = @transform_4, window_bounds = array<i64: 1, 128>}, {transform_indices = @transform_5, window_bounds = array<i64: 8, 128>}]} {
    %c0 = arith.constant 0 : index
    %c0_0 = arith.constant 0 : index
    %0 = vector.load %arg1[%c0, %c0_0] : memref<8x50xf32, #tpu.memory_space<vmem>>, vector<8x50xf32>
    %1 = arith.truncf %0 : vector<8x50xf32> to vector<8x50xbf16>
    %c0_1 = arith.constant 0 : index
    %c0_2 = arith.constant 0 : index
    %2 = vector.load %arg2[%c0_1, %c0_2] : memref<50x128xbf16, #tpu.memory_space<vmem>>, vector<50x128xbf16>
    %cst = arith.constant dense<0.000000e+00> : vector<8x128xf32>
    %3 = tpu.matmul %1, %2, %cst {dimension_numbers = #tpu.dot_dimension_numbers<[1], [0], [0], [1], [0, 0, 1, 1], [], []>} : vector<8x50xbf16>, vector<50x128xbf16>, vector<8x128xf32> -> vector<8x128xf32>
    %c0_3 = arith.constant 0 : index
    %c0_4 = arith.constant 0 : index
    %4 = vector.load %arg3[%c0_3, %c0_4] : memref<1x128xf32, #tpu.memory_space<vmem>>, vector<1x128xf32>
    %5 = vector.broadcast %4 : vector<1x128xf32> to vector<8x128xf32>
    %6 = arith.addf %3, %5 : vector<8x128xf32>
    %cst_5 = arith.constant 0.000000e+00 : f32
    %7 = vector.broadcast %cst_5 : f32 to vector<8x128xf32>
    %8 = arith.maximumf %6, %7 : vector<8x128xf32>
    %9 = arith.truncf %8 : vector<8x128xf32> to vector<8x128xbf16>
    %c0_6 = arith.constant 0 : index
    %c0_7 = arith.constant 0 : index
    %10 = vector.load %arg4[%c0_6, %c0_7] : memref<128x128xbf16, #tpu.memory_space<vmem>>, vector<128x128xbf16>
    %cst_8 = arith.constant dense<0.000000e+00> : vector<8x128xf32>
    %11 = tpu.matmul %9, %10, %cst_8 {dimension_numbers = #tpu.dot_dimension_numbers<[1], [0], [0], [1], [0, 0, 1, 1], [], []>} : vector<8x128xbf16>, vector<128x128xbf16>, vector<8x128xf32> -> vector<8x128xf32>
    %c0_9 = arith.constant 0 : index
    %c0_10 = arith.constant 0 : index
    %12 = vector.load %arg5[%c0_9, %c0_10] : memref<1x128xf32, #tpu.memory_space<vmem>>, vector<1x128xf32>
    %13 = vector.broadcast %12 : vector<1x128xf32> to vector<8x128xf32>
    %14 = arith.addf %11, %13 : vector<8x128xf32>
    %c0_11 = arith.constant 0 : index
    %c0_12 = arith.constant 0 : index
    %15 = vector.load %arg6[%c0_11, %c0_12] : memref<8x128xf32, #tpu.memory_space<vmem>>, vector<8x128xf32>
    tpu.vector_store %arg6[%c0_11, %c0_12], %14 {strides = array<i32>} : memref<8x128xf32, #tpu.memory_space<vmem>>, vector<8x128xf32>,
    return
  }
  func.func @transform_0(%arg0: i32) -> (i32, i32) {
    %c0_i32 = arith.constant 0 : i32
    %c0_i32_0 = arith.constant 0 : i32
    return %arg0, %c0_i32 : i32, i32
  }
  func.func @transform_1(%arg0: i32) -> (i32, i32) {
    %c0_i32 = arith.constant 0 : i32
    %c0_i32_0 = arith.constant 0 : i32
    %c0_i32_1 = arith.constant 0 : i32
    return %c0_i32, %c0_i32_0 : i32, i32
  }
  func.func @transform_2(%arg0: i32) -> (i32, i32) {
    %c0_i32 = arith.constant 0 : i32
    %c0_i32_0 = arith.constant 0 : i32
    %c0_i32_1 = arith.constant 0 : i32
    return %c0_i32, %c0_i32_0 : i32, i32
  }
  func.func @transform_3(%arg0: i32) -> (i32, i32) {
    %c0_i32 = arith.constant 0 : i32
    %c0_i32_0 = arith.constant 0 : i32
    %c0_i32_1 = arith.constant 0 : i32
    return %c0_i32, %c0_i32_0 : i32, i32
  }
  func.func @transform_4(%arg0: i32) -> (i32, i32) {
    %c0_i32 = arith.constant 0 : i32
    %c0_i32_0 = arith.constant 0 : i32
    %c0_i32_1 = arith.constant 0 : i32
    return %c0_i32, %c0_i32_0 : i32, i32
  }
  func.func @transform_5(%arg0: i32) -> (i32, i32) {
    %c0_i32 = arith.constant 0 : i32
    %c0_i32_0 = arith.constant 0 : i32
    return %arg0, %c0_i32 : i32, i32
  }
}

</mosaic_0001>

<bundles_post_ra>
// kernel: mlp_forward.1
= control target key start
LH: loop header
LB: loop body
LE: loop exit
PB: predicated region body
PF: predicated region fallthrough
CT: control target
= control target key end

     0   :  { %10 = vsyncpa [#allocation3], 0  ;;  %s431_s0 = inlined_call_operand.vmem [shape: f32[8,50], index: 0, kind: input, shape index: {}]   ;;  %s432_s1 = inlined_call_operand.hbm [shape: bf16[50,128], index: 1, kind: input, shape index: {}]   ;;  %s433_s2 = inlined_call_operand.vmem [shape: f32[1,128], index: 2, kind: input, shape index: {}]   ;;  %s434_s3 = inlined_call_operand.hbm [shape: bf16[128,128], index: 3, kind: input, shape index: {}]   ;;  %s435_s4 = inlined_call_operand.vmem [shape: f32[1,128], index: 4, kind: input, shape index: {}]   ;;  %s436_s5 = inlined_call_operand.vmem [shape: f32[8,128], index: 5, kind: output, shape index: {}]  }
   0x1   :  { %11 = vsyncpa [#allocation5], 0  ;;  %s377_s18 = smov [#allocation2]  }
   0x2   :  { %s19_s19 = sshll.u32 %s377_s18, 4  ;;  %s20_s19 = int_to_ptr.vmem [resolvable:$true] %s19_s19 }
   0x3   :  { %s341_s20 = scalar_lea.vmem %s20_s19, 448  ;;  %p346_p1 = scmp.lt.s32.totalorder %s20_s19, %s20_s19 }
   0x4   :  { %p342_p0 = scmp.ne.s32.totalorder %s20_s19, %s341_s20  ;;  %p347_p2 = scmp.lt.s32.totalorder %s341_s20, %s341_s20 }
   0x6   :  { %p348_p3 = por %p347_p2, %p346_p1 }
   0x8   :  { %p349_p4 = pnand %p348_p3, %p342_p0 }
   0xa   :  { %352 = shalt.err (!%p349_p4)
}
   0xb   :  { %s378_s21 = smov 64   ;;  %s379_s22 = smov 4  }
   0xc   :  { %25 = dma.hbm_to_vmem [thread:$0]  %s432_s1, 448, %s20_s19, [#allocation3], %s378_s21, %s378_s21, %s379_s22  }
   0xd   :  { %s380_s25 = smov [#allocation4]  }
   0xe   :  { %s33_s26 = sshll.u32 %s380_s25, 4  ;;  %s34_s26 = int_to_ptr.vmem [resolvable:$true] %s33_s26 }
   0xf   :  { %s361_s27 = scalar_lea.vmem %s34_s26, 1024  ;;  %p366_p6 = scmp.lt.s32.totalorder %s34_s26, %s34_s26 }
  0x10   :  { %p362_p5 = scmp.ne.s32.totalorder %s34_s26, %s361_s27  ;;  %p367_p7 = scmp.lt.s32.totalorder %s361_s27, %s361_s27 }
  0x12   :  { %p368_p8 = por %p367_p7, %p366_p6 }
  0x14   :  { %p369_p9 = pnand %p368_p8, %p362_p5 }
  0x16   :  { %372 = shalt.err (!%p369_p9)
}
  0x17   :  { %39 = dma.hbm_to_vmem [thread:$0]  %s434_s3, 1024, %s34_s26, [#allocation5], %s378_s21, %s378_s21, %s379_s22  }
  0x18   :  { %373 = dma.done.wait [#allocation3], 448  }
  0x19   :  { %374 = vsyncadd [#allocation3], 4294966848 }
  0x1a   :  { %375 = dma.done.wait [#allocation5], 1024  }
  0x1b   :  { %376 = vsyncadd [#allocation5], 4294966272  ;;  %v381_v0 = vmov 0.0   ;;  %vm382_vm0 = vmmov 0   ;;  %vm90_vm1 = vcmask 1040384   ;;  %v322_v3 = vld [vmem:[#allocation2 + $0x10] sm:$0xff]  }
  0x1c   :  { %283 = vmatprep.subr.bf16.mxu0 %v381_v0  ;;  %291 = vmatprep.mubr.msk.bf16.mxu0 %vm382_vm0, %v381_v0  ;;  %v321_v1 = vld [vmem:[#allocation2 + $0x18] ss:$0 sps:$4 sm:$0x11]   ;;  %v326_v5 = vld [vmem:[#allocation4 + $0x30] sm:$0xff]   ;;  %v324_v7 = vld [vmem:[#allocation2] sm:$0xff]   ;;  %vm86_vm2 = vcmask 408576  }
  0x1d   :  { %295 = vmatprep.subr.bf16.mxu1 %v381_v0  ;;  %311 = vmatprep.mubr.msk.bf16.mxu1 %vm382_vm0, %v381_v0  ;;  %v92_v2 = vsel %vm90_vm1, %v321_v1, 0  ;;  %v325_v4 = vld [vmem:[#allocation4 + $0x38] sm:$0xff]   ;;  %v323_v6 = vld [vmem:[#allocation2 + $0x8] sm:$0xff]   ;;  %v49_v9 = vld [vmem:[%s431_s0] sm:$0xff] }
  0x1e   :  { %284 = vmatpush3.bf16.msra.mxu0 %v92_v2  ;;  %296 = vmatpush3.bf16.msra.mxu1 %v325_v4  ;;  %v327_v8 = vld [vmem:[#allocation4 + $0x28] sm:$0xff]   ;;  %v50_v10 = vpack.c.bf16 %v49_v9, %v49_v9  ;;  %v328_v11 = vld [vmem:[#allocation4 + $0x20] sm:$0xff]   ;;  %v329_v12 = vld [vmem:[#allocation4 + $0x18] sm:$0xff]  }
  0x1f   :  { %285 = vmatprep.subr.bf16.mxu0 %v381_v0  ;;  %297 = vmatprep.subr.bf16.mxu1 %v381_v0  ;;  %v330_v13 = vld [vmem:[#allocation4 + $0x10] sm:$0xff]   ;;  %v331_v14 = vld [vmem:[#allocation4 + $0x8] sm:$0xff]   ;;  %v332_v15 = vld [vmem:[#allocation4] sm:$0xff]  }
  0x20   :  { %v254_v16 = vld [vmem:[%s433_s2] ss:$0 sm:$0xff] }
  0x21   :  { %v260_v24 = vld [vmem:[%s435_s4] ss:$0 sm:$0xff] }
  0x22   :  { %286 = vmatpush3.bf16.msra.mxu0 %v322_v3  ;;  %298 = vmatpush3.bf16.msra.mxu1 %v326_v5 }
  0x23   :  { %287 = vmatprep.subr.bf16.mxu0 %v381_v0  ;;  %299 = vmatprep.subr.bf16.mxu1 %v381_v0 }
  0x26   :  { %288 = vmatpush3.bf16.msra.mxu0 %v323_v6  ;;  %300 = vmatpush3.bf16.msra.mxu1 %v327_v8 }
  0x27   :  { %289 = vmatprep.subr.bf16.mxu0 %v381_v0  ;;  %301 = vmatprep.subr.bf16.mxu1 %v381_v0 }
  0x2a   :  { %290 = vmatpush3.bf16.msra.mxu0 %v324_v7  ;;  %302 = vmatpush3.bf16.msra.mxu1 %v328_v11 }
  0x2b   :  { %303 = vmatprep.subr.bf16.mxu1 %v381_v0 }
  0x2d   :  { %292 = vmatmul.mubr.msk.bf16.vlgmr.msra.gmra.mxu0 %vm86_vm2, %v50_v10 }
  0x2e   :  { %304 = vmatpush3.bf16.msra.mxu1 %v329_v12 }
  0x2f   :  { %305 = vmatprep.subr.bf16.mxu1 %v381_v0 }
  0x32   :  { %306 = vmatpush3.bf16.msra.mxu1 %v330_v13 }
  0x33   :  { %307 = vmatprep.subr.bf16.mxu1 %v381_v0 }
  0x36   :  { %308 = vmatpush3.bf16.msra.mxu1 %v331_v14 }
  0x37   :  { %309 = vmatprep.subr.bf16.mxu1 %v381_v0 }
  0x3a   :  { %310 = vmatpush3.bf16.msra.mxu1 %v332_v15 }
  0xed   :  { %v128_v17 = vpop.f32.mrf.mxu0 }
  0xee   :  { %v129_v18 = vadd.f32 %v254_v16, %v128_v17 }
  0xef   :  { %v293_v19 = vpop.f32.mrf.mxu0 }
  0xf0   :  { %v134_v20 = vmax.f32 %v129_v18, 0.0 }
  0xf1   :  { %v131_v21 = vpop.f32.mrf.mxu0 }
  0xf2   :  { %v135_v22 = vpack.c.bf16 %v134_v20, %v134_v20 }
  0xf3   :  { %v294_v23 = vpop.f32.mrf.mxu0 }
  0xf4   :  { %312 = vmatmul.mubr.bf16.vlgmr.msra.gmra.mxu1 %v135_v22 }
 0x1b4   :  { %v241_v25 = vpop.f32.mrf.mxu1 }
 0x1b5   :  { %v242_v26 = vadd.f32 %v260_v24, %v241_v25 }
 0x1b6   :  { %v313_v27 = vpop.f32.mrf.mxu1 }
 0x1b7   :  { %247 = vst [vmem:[%s436_s5] sm:$0xff] %v242_v26 }
 0x1b8   :  { %v244_v28 = vpop.f32.mrf.mxu1 }
 0x1ba   :  { %v314_v29 = vpop.f32.mrf.mxu1 }
 0x1bb   :  { %252 = vsyncpa [#allocation3], 1 }
 0x1bc   :  { %253 = vsyncpa [#allocation5], 1 }

</bundles_post_ra>
